<compile_context>
chip_gen: v6e
topology: v6e:2x2x1
jax: 0.10.0
libtpu: 0.0.40
codegen_flags: <defaults>
</compile_context>

<pallas_src>
import functools

import jax
import jax.numpy as jnp
from jax import lax
from jax.experimental import pallas as pl
from jax.experimental.pallas import tpu as pltpu


_OUT_COLS = 8  # lanes 0..4 = pcc, row_sx, row_sy, w1, w2; lanes 5..7 unused.


def _ccc_tile_kernel(x_ref, y_ref, out_ref, *, eps: float, inv_d: float):
    """One (tile_b, D) row block -> one (tile_b, 8) partials block.

    Per row emits:
      lane 0: pcc  -- cosine similarity of the row-mean-centered rows
      lane 1: sx   -- raw row sum of x   (-> global mean in the epilogue)
      lane 2: sy   -- raw row sum of y
      lane 3: w1   -- row-centered sum of squares of x (-> global var via the
      lane 4: w2   -- row-centered sum of squares of y    within/between-row
                                                           decomposition)
    """
    x = x_ref[...].astype(jnp.float32)          # (tile_b, D)
    y = y_ref[...].astype(jnp.float32)

    # Raw per-row sums (lane/XLU reductions; VPU stays free for the products).
    row_sx = jnp.sum(x, axis=1, keepdims=True)  # (tile_b, 1)
    row_sy = jnp.sum(y, axis=1, keepdims=True)

    # Row-mean centering: shift-invariant "pivot" form; x/y are dead right
    # after, keeping live full-tile temporaries low (helps fusion on v7x/v5e).
    xc = x - row_sx * inv_d
    yc = y - row_sy * inv_d

    w12 = jnp.sum(xc * yc, axis=1, keepdims=True)
    w1 = jnp.sum(xc * xc, axis=1, keepdims=True)
    w2 = jnp.sum(yc * yc, axis=1, keepdims=True)

    # dot / sqrt(clamp(w1*w2, eps^2)) -- rsqrt goes to the (idle) EUP slot.
    pcc = w12 * lax.rsqrt(jnp.maximum(w1 * w2, eps * eps))

    # Pack the five per-row scalars into one (tile_b, 8) slab and store once.
    rows = pcc.shape[0]
    lane = lax.broadcasted_iota(jnp.int32, (rows, _OUT_COLS), 1)
    out = (jnp.where(lane == 0, pcc, 0.0)
           + jnp.where(lane == 1, row_sx, 0.0)
           + jnp.where(lane == 2, row_sy, 0.0)
           + jnp.where(lane == 3, w1, 0.0)
           + jnp.where(lane == 4, w2, 0.0))
    out_ref[...] = out


def _auto_tile_b(B: int, D: int, itemsize: int, sub: int) -> int:
    # ~2 MiB of HBM bytes per input block (>=85% roofline plateau) and a
    # separate cap on the per-tile f32 intermediate footprint (dtype-aware).
    hbm_target = 2 << 20
    f32_cap = 4 << 20
    rows_hbm = hbm_target // max(1, D * itemsize)
    rows_f32 = f32_cap // max(1, D * 4)
    tile_b = max(sub, (min(rows_hbm, rows_f32) // sub) * sub)
    if tile_b >= B:
        return B  # single full-array block (exempt from the sublane rule)
    # Nudge toward an even tile count so both v7x TensorCores get work.
    num_tiles = -(-B // tile_b)
    if num_tiles % 2 == 1:
        cand = -(-B // (num_tiles + 1))
        cand = ((cand + sub - 1) // sub) * sub
        if sub <= cand < tile_b:
            tile_b = cand
    return tile_b


def concordance_cc_loss(inputs: jax.Array, targets: jax.Array,
                        eps: float = 1e-8, tile_b: int | None = None) -> jax.Array:
    """Pallas TPU implementation of ConcordanceCCLoss.forward.

    inputs, targets: (B, D) float arrays.  Returns (B,) float32 loss.
    NOTE: B*D == 1 divides by (n-1) = 0 -> NaN, matching torch.var default.
    """
    assert inputs.shape == targets.shape and inputs.ndim == 2
    B, D = inputs.shape
    n = B * D

    itemsize = jnp.dtype(inputs.dtype).itemsize
    sub = 8 if itemsize >= 4 else 16  # sublane packing (f32 vs bf16/fp16)

    if tile_b is None:
        tile_b = _auto_tile_b(B, D, itemsize, sub)
    else:
        tile_b = min(tile_b, B)
        if tile_b < B:
            assert tile_b % sub == 0, "tile_b must be a multiple of the sublane packing"

    num_tiles = pl.cdiv(B, tile_b)

    kernel = functools.partial(_ccc_tile_kernel, eps=float(eps), inv_d=1.0 / D)

    grid_spec = pltpu.PrefetchScalarGridSpec(
        num_scalar_prefetch=0,
        grid=(num_tiles,),
        in_specs=[
            pl.BlockSpec((tile_b, D), lambda i: (i, 0)),
            pl.BlockSpec((tile_b, D), lambda i: (i, 0)),
        ],
        out_specs=pl.BlockSpec((tile_b, _OUT_COLS), lambda i: (i, 0)),
    )
    cost = pl.CostEstimate(
        flops=12 * B * D,
        transcendentals=B,
        bytes_accessed=2 * B * D * itemsize + B * _OUT_COLS * 4,
    )

    parts = pl.pallas_call(
        kernel,
        out_shape=jax.ShapeDtypeStruct((B, _OUT_COLS), jnp.float32),
        grid_spec=grid_spec,
        compiler_params=pltpu.CompilerParams(
            # Row axis carries no cross-tile accumulation -> shard it across
            # both TensorCores on v7x (neutral on single-TC v5e/v6e).
            dimension_semantics=("parallel",),
            # 2 inputs x 2 pipeline buffers x ~2 MiB + f32 intermediates:
            # ~14-20 MiB.  32 MiB covers v5e's 16 MiB scoped default and is
            # <= the v6e/v7x scoped defaults.
            vmem_limit_bytes=32 * 1024 * 1024,
        ),
        cost_estimate=cost,
    )(inputs, targets)

    # ---- O(B) epilogue in plain JAX: combine per-row partials. ----
    pcc = parts[:, 0]
    row_sx = parts[:, 1]
    row_sy = parts[:, 2]
    w1 = parts[:, 3]
    w2 = parts[:, 4]

    mean_x = jnp.sum(row_sx) / n
    mean_y = jnp.sum(row_sy) / n
    row_mx = row_sx / D
    row_my = row_sy / D
    # Total SS = within-row SS + between-row SS (exact identity; avoids the
    # one-pass sum/sumsq cancellation).
    ss_x = jnp.sum(w1) + D * jnp.sum((row_mx - mean_x) ** 2)
    ss_y = jnp.sum(w2) + D * jnp.sum((row_my - mean_y) ** 2)
    var_x = ss_x / (n - 1)  # torch.var default: unbiased
    var_y = ss_y / (n - 1)
    std_x = jnp.sqrt(var_x)
    std_y = jnp.sqrt(var_y)

    ccc = (2.0 * pcc * std_x * std_y) / (
        var_x + var_y + (mean_y - mean_x) ** 2 + eps
    )
    return 1.0 - ccc


def _reference(inputs, targets, eps=1e-8):
    # Pure-JAX reference mirroring the PyTorch module, for sanity checking.
    x = inputs.astype(jnp.float32)
    y = targets.astype(jnp.float32)
    n = x.size
    xm, ym = jnp.mean(x), jnp.mean(y)
    xv = jnp.sum((x - xm) ** 2) / (n - 1)
    yv = jnp.sum((y - ym) ** 2) / (n - 1)
    xs, ys = jnp.sqrt(xv), jnp.sqrt(yv)
    xc = x - jnp.mean(x, axis=1, keepdims=True)
    yc = y - jnp.mean(y, axis=1, keepdims=True)
    w12 = jnp.sum(xc * yc, axis=1)
    w1 = jnp.sum(xc * xc, axis=1)
    w2 = jnp.sum(yc * yc, axis=1)
    pcc = w12 / jnp.sqrt(jnp.maximum(w1 * w2, eps * eps))
    ccc = 2.0 * pcc * xs * ys / (xv + yv + (ym - xm) ** 2 + eps)
    return 1.0 - ccc


if __name__ == "__main__":
    key = jax.random.PRNGKey(0)
    k1, k2, k3, k4 = jax.random.split(key, 4)

    # Case 1: multi-tile grid (B=32 rows, tile_b=8 -> grid=(4,)), D=256 lanes.
    B, D = 32, 256
    x1 = jax.random.normal(k1, (B, D), dtype=jnp.float32)
    y1 = 0.7 * x1 + 0.3 * jax.random.normal(k2, (B, D), dtype=jnp.float32)
    loss_fn = jax.jit(functools.partial(concordance_cc_loss, tile_b=8))
    loss1 = loss_fn(x1, y1)
    jax.block_until_ready(loss1)
    ref1 = _reference(x1, y1)
    assert loss1.shape == (B,)
    assert jnp.allclose(loss1, ref1, atol=1e-4, rtol=1e-4), (loss1, ref1)

    # Case 2: B not a multiple of tile_b -> ragged final block (no padding).
    B2, D2 = 13, 256
    x2 = jax.random.normal(k3, (B2, D2), dtype=jnp.float32)
    y2 = 0.5 * x2 + 0.5 * jax.random.normal(k4, (B2, D2), dtype=jnp.float32)
    loss2 = jax.jit(functools.partial(concordance_cc_loss, tile_b=8))(x2, y2)
    jax.block_until_ready(loss2)
    ref2 = _reference(x2, y2)
    assert loss2.shape == (B2,)
    assert jnp.allclose(loss2, ref2, atol=1e-4, rtol=1e-4), (loss2, ref2)

    # Case 3: auto tiling -> single full-array block fast path (no grid loop).
    loss3 = jax.jit(concordance_cc_loss)(x2, y2)
    jax.block_until_ready(loss3)
    assert jnp.allclose(loss3, ref2, atol=1e-4, rtol=1e-4), (loss3, ref2)

    print("KERNEL_OK")
</pallas_src>

<mosaic_0001>
module attributes {stable_mosaic.version = 11 : i64} {
  func.func @_ccc_tile_kernel(%arg0: i32, %arg1: memref<8x256xf32, #tpu.memory_space<vmem>>, %arg2: memref<8x256xf32, #tpu.memory_space<vmem>>, %arg3: memref<8x8xf32, #tpu.memory_space<vmem>>) attributes {dimension_semantics = [#tpu.dimension_semantics<parallel>], iteration_bounds = array<i64: 4>, scalar_prefetch = 0 : i64, scratch_operands = 0 : i64, tpu.core_type = #tpu.core_type<tc>, window_params = [{transform_indices = @transform_0, window_bounds = array<i64: 8, 256>}, {transform_indices = @transform_1, window_bounds = array<i64: 8, 256>}, {transform_indices = @transform_2, window_bounds = array<i64: 8, 8>}]} {
    %c0 = arith.constant 0 : index
    %c0_0 = arith.constant 0 : index
    %0 = vector.load %arg1[%c0, %c0_0] : memref<8x256xf32, #tpu.memory_space<vmem>>, vector<8x256xf32>
    %c0_1 = arith.constant 0 : index
    %c0_2 = arith.constant 0 : index
    %1 = vector.load %arg2[%c0_1, %c0_2] : memref<8x256xf32, #tpu.memory_space<vmem>>, vector<8x256xf32>
    %cst = arith.constant dense<0.000000e+00> : vector<8xf32>
    %2 = vector.multi_reduction <add>, %0, %cst [1] : vector<8x256xf32> to vector<8xf32>
    %3 = vector.shape_cast %2 : vector<8xf32> to vector<8x1xf32>
    %cst_3 = arith.constant dense<0.000000e+00> : vector<8xf32>
    %4 = vector.multi_reduction <add>, %1, %cst_3 [1] : vector<8x256xf32> to vector<8xf32>
    %5 = vector.shape_cast %4 : vector<8xf32> to vector<8x1xf32>
    %cst_4 = arith.constant 3.906250e-03 : f32
    %6 = vector.broadcast %cst_4 : f32 to vector<8x1xf32>
    %7 = arith.mulf %3, %6 : vector<8x1xf32>
    %8 = vector.broadcast %7 : vector<8x1xf32> to vector<8x256xf32>
    %9 = arith.subf %0, %8 : vector<8x256xf32>
    %cst_5 = arith.constant 3.906250e-03 : f32
    %10 = vector.broadcast %cst_5 : f32 to vector<8x1xf32>
    %11 = arith.mulf %5, %10 : vector<8x1xf32>
    %12 = vector.broadcast %11 : vector<8x1xf32> to vector<8x256xf32>
    %13 = arith.subf %1, %12 : vector<8x256xf32>
    %14 = arith.mulf %9, %13 : vector<8x256xf32>
    %cst_6 = arith.constant dense<0.000000e+00> : vector<8xf32>
    %15 = vector.multi_reduction <add>, %14, %cst_6 [1] : vector<8x256xf32> to vector<8xf32>
    %16 = vector.shape_cast %15 : vector<8xf32> to vector<8x1xf32>
    %17 = arith.mulf %9, %9 : vector<8x256xf32>
    %cst_7 = arith.constant dense<0.000000e+00> : vector<8xf32>
    %18 = vector.multi_reduction <add>, %17, %cst_7 [1] : vector<8x256xf32> to vector<8xf32>
    %19 = vector.shape_cast %18 : vector<8xf32> to vector<8x1xf32>
    %20 = arith.mulf %13, %13 : vector<8x256xf32>
    %cst_8 = arith.constant dense<0.000000e+00> : vector<8xf32>
    %21 = vector.multi_reduction <add>, %20, %cst_8 [1] : vector<8x256xf32> to vector<8xf32>
    %22 = vector.shape_cast %21 : vector<8xf32> to vector<8x1xf32>
    %23 = arith.mulf %19, %22 : vector<8x1xf32>
    %cst_9 = arith.constant 1.000000e-16 : f32
    %24 = vector.broadcast %cst_9 : f32 to vector<8x1xf32>
    %25 = arith.maximumf %23, %24 : vector<8x1xf32>
    %26 = math.rsqrt %25 : vector<8x1xf32>
    %27 = arith.mulf %16, %26 : vector<8x1xf32>
    %28 = tpu.iota {dimensions = array<i32: 1>} : vector<8x8xi32>
    %c0_i32 = arith.constant 0 : i32
    %29 = vector.broadcast %c0_i32 : i32 to vector<8x8xi32>
    %30 = arith.cmpi eq, %28, %29 : vector<8x8xi32>
    %cst_10 = arith.constant 0.000000e+00 : f32
    %31 = vector.shape_cast %27 : vector<8x1xf32> to vector<8x1xf32>
    %32 = vector.broadcast %31 : vector<8x1xf32> to vector<8x8xf32>
    %33 = vector.broadcast %cst_10 : f32 to vector<8x8xf32>
    %34 = arith.select %30, %32, %33 : vector<8x8xi1>, vector<8x8xf32>
    %c1_i32 = arith.constant 1 : i32
    %35 = vector.broadcast %c1_i32 : i32 to vector<8x8xi32>
    %36 = arith.cmpi eq, %28, %35 : vector<8x8xi32>
    %cst_11 = arith.constant 0.000000e+00 : f32
    %37 = vector.shape_cast %3 : vector<8x1xf32> to vector<8x1xf32>
    %38 = vector.broadcast %37 : vector<8x1xf32> to vector<8x8xf32>
    %39 = vector.broadcast %cst_11 : f32 to vector<8x8xf32>
    %40 = arith.select %36, %38, %39 : vector<8x8xi1>, vector<8x8xf32>
    %41 = arith.addf %34, %40 : vector<8x8xf32>
    %c2_i32 = arith.constant 2 : i32
    %42 = vector.broadcast %c2_i32 : i32 to vector<8x8xi32>
    %43 = arith.cmpi eq, %28, %42 : vector<8x8xi32>
    %cst_12 = arith.constant 0.000000e+00 : f32
    %44 = vector.shape_cast %5 : vector<8x1xf32> to vector<8x1xf32>
    %45 = vector.broadcast %44 : vector<8x1xf32> to vector<8x8xf32>
    %46 = vector.broadcast %cst_12 : f32 to vector<8x8xf32>
    %47 = arith.select %43, %45, %46 : vector<8x8xi1>, vector<8x8xf32>
    %48 = arith.addf %41, %47 : vector<8x8xf32>
    %c3_i32 = arith.constant 3 : i32
    %49 = vector.broadcast %c3_i32 : i32 to vector<8x8xi32>
    %50 = arith.cmpi eq, %28, %49 : vector<8x8xi32>
    %cst_13 = arith.constant 0.000000e+00 : f32
    %51 = vector.shape_cast %19 : vector<8x1xf32> to vector<8x1xf32>
    %52 = vector.broadcast %51 : vector<8x1xf32> to vector<8x8xf32>
    %53 = vector.broadcast %cst_13 : f32 to vector<8x8xf32>
    %54 = arith.select %50, %52, %53 : vector<8x8xi1>, vector<8x8xf32>
    %55 = arith.addf %48, %54 : vector<8x8xf32>
    %c4_i32 = arith.constant 4 : i32
    %56 = vector.broadcast %c4_i32 : i32 to vector<8x8xi32>
    %57 = arith.cmpi eq, %28, %56 : vector<8x8xi32>
    %cst_14 = arith.constant 0.000000e+00 : f32
    %58 = vector.shape_cast %22 : vector<8x1xf32> to vector<8x1xf32>
    %59 = vector.broadcast %58 : vector<8x1xf32> to vector<8x8xf32>
    %60 = vector.broadcast %cst_14 : f32 to vector<8x8xf32>
    %61 = arith.select %57, %59, %60 : vector<8x8xi1>, vector<8x8xf32>
    %62 = arith.addf %55, %61 : vector<8x8xf32>
    %c0_15 = arith.constant 0 : index
    %c0_16 = arith.constant 0 : index
    %63 = vector.load %arg3[%c0_15, %c0_16] : memref<8x8xf32, #tpu.memory_space<vmem>>, vector<8x8xf32>
    tpu.vector_store %arg3[%c0_15, %c0_16], %62 {strides = array<i32>} : memref<8x8xf32, #tpu.memory_space<vmem>>, vector<8x8xf32>,
    return
  }
  func.func @transform_0(%arg0: i32) -> (i32, i32) {
    %c0_i32 = arith.constant 0 : i32
    %c0_i32_0 = arith.constant 0 : i32
    return %arg0, %c0_i32 : i32, i32
  }
  func.func @transform_1(%arg0: i32) -> (i32, i32) {
    %c0_i32 = arith.constant 0 : i32
    %c0_i32_0 = arith.constant 0 : i32
    return %arg0, %c0_i32 : i32, i32
  }
  func.func @transform_2(%arg0: i32) -> (i32, i32) {
    %c0_i32 = arith.constant 0 : i32
    %c0_i32_0 = arith.constant 0 : i32
    return %arg0, %c0_i32 : i32, i32
  }
}

</mosaic_0001>

<bundles_post_ra>
// kernel: concordance_cc_loss.1
= control target key start
LH: loop header
LB: loop body
LE: loop exit
PB: predicated region body
PF: predicated region fallthrough
CT: control target
= control target key end

     0   :  { %7 = vsyncpa [#allocation3], 0  ;;  %s667_s0 = inlined_call_operand.hbm [shape: f32[32,256], index: 0, kind: input, shape index: {}]   ;;  %s668_s1 = inlined_call_operand.hbm [shape: f32[32,256], index: 1, kind: input, shape index: {}]   ;;  %s669_s2 = inlined_call_operand.vmem [shape: f32[32,8], index: 2, kind: output, shape index: {}]  }
   0x1   :  { %9 = vsyncpa [#allocation3 + $0x1], 0 }
   0x2   :  { %10 = vsyncpa [#allocation5], 0 }
   0x3   :  { %12 = vsyncpa [#allocation5 + $0x1], 0  ;;  %s515_s9 = smov 0   ;;  %s517_s10 = smov 0  }
   0x4   :  { %s519_s11 = smov 0   ;;  %s521_s12 = smov 0  }
   0x5 LB: > { %s534_s13 = sadd.s32 4294967295, %s496_s12   ;;  %s537_s14 = sadd.s32 1, %s496_s12   ;;  %s496_s12 = sphi %s521_s12, %s681_s12   ;;  %s492_s11 = sphi %s519_s11, %s680_s11   ;;  %s488_s10 = sphi %s517_s10, %s679_s10   ;;  %s484_s9 = sphi %s515_s9, %s678_s9  }
   0x6   : > { %s22_s15 = ssub.s32 %s496_s12, %s537_s14  ;;  %s25_s16 = sadd.s32 1, %s492_s11 }
   0x7   : > { %p23_p0 = scmp.eq.s32.totalorder %s22_s15, 0  ;;  %p32_p1 = scmp.ne.s32.totalorder %s492_s11, %s488_s10 }
   0x8   : > { %p33_p2 = scmp.eq.s32.totalorder %s496_s12, 0  ;;  %p38_p3 = scmp.ne.s32.totalorder %s488_s10, %s484_s9 }
   0x9   : > { %s547_s17 = scalar_select %p23_p0, %s492_s11, %s25_s16  }
   0xa   : > { %p34_p4 = por %p33_p2, %p32_p1  ;;  %p39_p5 = scmp.eq.s32.totalorder %s534_s13, 0 }
   0xb   : > { %p367_p6 = scmp.lt.s32.totalorder %s496_s12, 4  ;;  %s556_s19 = sand.u32 1, %s492_s11  }
   0xc   : > { %p551_p7 = por %p39_p5, %p38_p3  ;;  %s342_s20 = sshll.u32 %s556_s19, 4 }
   0xd   : > { %s354_s21 = sshll.u32 %s496_s12, 8  ;;  %s118_s25 = scalar_lea.vmem [#allocation2], %s342_s20 }
   0xe   : > { %s671_s18 = scalar_select %p551_p7, 1, 0 }
   0xf   : > { %s565_s24 = scalar_lea.hbm %s667_s0, %s354_s21  ;;  %s126_s26 = sshll.u32 %s118_s25, 4  ;;  %s569_s26 = int_to_ptr.vmem [resolvable:$true] %s126_s26 }
  0x10   : > { %p571_p8 = pnand %p367_p6, %p34_p4  ;;  %s115_s28 = scalar_lea.sflag [#allocation3], %s556_s19 }
  0x11   : > { %s402_s29 = scalar_lea.hbm %s565_s24, 256  ;;  %s407_s4 = scalar_lea.hbm %s667_s0, 1024 }
  0x12   : > { %p403_p11 = scmp.ne.s32.totalorder %s565_s24, %s402_s29  ;;  %p404_p12 = pneg %p571_p8 }
  0x13   : > { %p408_p1 = scmp.lt.s32.totalorder %s565_s24, %s667_s0  ;;  %p409_p2 = scmp.lt.s32.totalorder %s407_s4, %s402_s29 }
  0x14   : > { %p405_p13 = pnand %p404_p12, %p403_p11 }
  0x15   : > { %p410_p3 = por %p409_p2, %p408_p1 }
  0x16   : > { %p406_p0 = pneg %p405_p13 }
  0x18   : > { %p411_p4 = pnand %p410_p3, %p406_p0 }
  0x1a   : > { %414 = shalt.err (!%p411_p4)
}
  0x1b   : > { %s415_s7 = scalar_lea.vmem %s569_s26, 256  ;;  %s498_s8 = smov [#allocation2]  }
  0x1c   : > { %p416_p5 = scmp.ne.s32.totalorder %s569_s26, %s415_s7  ;;  %s420_s9 = sshll.u32 %s498_s8, 4  ;;  %s421_s9 = int_to_ptr.vmem [resolvable:$false] %s420_s9 }
  0x1d   : > { %s422_s15 = scalar_lea.vmem %s421_s9, 512  ;;  %p423_p13 = scmp.lt.s32.totalorder %s569_s26, %s421_s9 }
  0x1e   : > { %p418_p6 = pnand %p416_p5, %p404_p12  ;;  %p424_p9 = scmp.lt.s32.totalorder %s422_s15, %s415_s7 }
  0x20   : > { %p419_p11 = pneg %p418_p6  ;;  %p425_p10 = por %p424_p9, %p423_p13 }
  0x22   : > { %p426_p1 = pnand %p425_p10, %p419_p11 }
  0x24   : > { %429 = shalt.err (!%p426_p1)
}
  0x25   : > { %363 = dma.hbm_to_vmem [thread:$0]  (!%p571_p8), %s565_s24, 256, %s569_s26, %s115_s28  }
  0x26   : > { %p673_p0 = scmp.lt.s32.totalorder %s496_s12, 5  ;;  %p674_p2 = scmp.ge.s32.totalorder %s496_s12, 1 }
  0x27   : > { %s615_s25 = scalar_lea.hbm %s668_s1, %s354_s21  ;;  %s137_s29 = scalar_lea.vmem [#allocation4], %s342_s20 }
  0x28   : > { %p606_p3 = pnand %p674_p2, %p673_p0  ;;  %s145_s30 = sshll.u32 %s137_s29, 4  ;;  %s146_s30 = int_to_ptr.vmem [resolvable:$true] %s145_s30 }
  0x29   : > { %s134_s24 = scalar_lea.sflag [#allocation5], %s556_s19  ;;  %s430_s26 = scalar_lea.hbm %s615_s25, 256 }
  0x2a   : > { %s675_s16 = scalar_select %p606_p3, 1, 0 }
  0x2b   : > { %p431_p9 = scmp.ne.s32.totalorder %s615_s25, %s430_s26  ;;  %s435_s3 = scalar_lea.hbm %s668_s1, 1024 }
  0x2c   : > { %p436_p5 = scmp.lt.s32.totalorder %s615_s25, %s668_s1  ;;  %p437_p6 = scmp.lt.s32.totalorder %s435_s3, %s430_s26 }
  0x2d   : > { %p433_p10 = pnand %p431_p9, %p404_p12 }
  0x2e   : > { %p438_p11 = por %p437_p6, %p436_p5 }
  0x2f   : > { %p434_p4 = pneg %p433_p10 }
  0x31   : > { %p439_p13 = pnand %p438_p11, %p434_p4 }
  0x33   : > { %442 = shalt.err (!%p439_p13)
}
  0x34   : > { %s443_s20 = scalar_lea.vmem %s146_s30, 256  ;;  %s499_s19 = smov [#allocation4]  }
  0x35   : > { %p444_p1 = scmp.ne.s32.totalorder %s146_s30, %s443_s20  ;;  %s448_s5 = sshll.u32 %s499_s19, 4  ;;  %s449_s5 = int_to_ptr.vmem [resolvable:$false] %s448_s5 }
  0x36   : > { %s450_s6 = scalar_lea.vmem %s449_s5, 512  ;;  %p451_p9 = scmp.lt.s32.totalorder %s146_s30, %s449_s5 }
  0x37   : > { %p446_p0 = pnand %p444_p1, %p404_p12  ;;  %p452_p10 = scmp.lt.s32.totalorder %s450_s6, %s443_s20 }
  0x39   : > { %p447_p2 = pneg %p446_p0  ;;  %p453_p7 = por %p452_p10, %p451_p9 }
  0x3b   : > { %p454_p3 = pnand %p453_p7, %p447_p2 }
  0x3d   : > { %457 = shalt.err (!%p454_p3)
}
  0x3e   : > { %366 = dma.hbm_to_vmem [thread:$0]  (!%p571_p8), %s615_s25, 256, %s146_s30, %s134_s24  }
  0x3f   : > { %p676_p4 = scmp.ne.s32.totalorder %s675_s16, 0 }
  0x40   : > { %s156_s7 = sand.u32 (!%p676_p4), 1, %s488_s10   ;;  %p677_p12 = scmp.ne.s32.totalorder (!%p676_p4), %s671_s18, 0 }
  0x41   : > { %154 = sbr.rel (%p676_p4) target bundleno = 394 (0x18a), region = 28  ;;  %s349_s8 = sshll.u32 (!%p676_p4), %s156_s7, 4 }
  0x42   : > { %s157_s9 = scalar_lea.sflag (!%p676_p4), [#allocation3], %s156_s7  ;;  %s160_s15 = scalar_lea.vmem (!%p676_p4), [#allocation2], %s349_s8 }
  0x46   : > { %475 = dma.done.wait (%p677_p12), %s157_s9, 256  }
  0x47   : > { %477 = vsyncadd (%p677_p12), %s157_s9, 4294967040  ;;  %s166_s22 = scalar_lea.sflag [#allocation5], %s156_s7  ;;  %s169_s23 = scalar_lea.vmem [#allocation4], %s349_s8 }
  0x48   : > { %479 = dma.done.wait (%p677_p12), %s166_s22, 256  }
  0x49   : > { %481 = vsyncadd (%p677_p12), %s166_s22, 4294967040  ;;  %v198_v0 = vld [vmem:[%s160_s15] sm:$0xff]  ;;  %v199_v1 = vld [vmem:[%s160_s15 + $0x8] sm:$0xff]  ;;  %v233_v27 = vlaneseq  ;;  %p194_p7 = scmp.lt.s32.totalorder %s534_s13, 3  ;;  %vm249_vm5 = vcmask 64512  }
  0x4a   : > { %v200_v2 = vld [vmem:[%s169_s23] sm:$0xff]  ;;  %v202_v3 = vadd.f32 %v199_v1, %v198_v0  ;;  %v201_v4 = vld [vmem:[%s169_s23 + $0x8] sm:$0xff] }
  0x4b   : > { %v205_v5 = vadd.f32 %v201_v4, %v200_v2  ;;  %v234_v28 = vand.u32 127, %v233_v27  ;;  %s683_s13 = smov (!%p194_p7, %s534_s13), 3 }
  0x4c   : > { %203 = vadd.xlane.f32.xlu0 %v202_v3  ;;  %s351_s18 = sshll.u32 %s683_s13, 3 }
  0x4d   : > { %vm237_vm0 = vcmp.eq.s32.totalorder %v234_v28, 1  ;;  %vm235_vm1 = vcmp.eq.s32.totalorder %v234_v28, 0  ;;  %vm240_vm2 = vcmp.eq.s32.totalorder %v234_v28, 2  ;;  %vm243_vm3 = vcmp.eq.s32.totalorder %v234_v28, 3  ;;  %s197_s25 = scalar_lea.vmem %s669_s2, %s351_s18 }
  0x4e   : > { %vm246_vm4 = vcmp.eq.s32.totalorder %v234_v28, 4 }
  0x50   : > { %206 = vadd.xlane.f32.xlu0 %v205_v5 }
  0xd5   : > { %v204_v6 = vpop.xlane.xlu0 %203 }
  0xd6   : > { %v208_v7 = vmul.f32 0.00390625, %v204_v6  ;;  %v238_v32 = vsel %vm237_vm0, %v204_v6, 0.0 }
  0xd8   : > { %v209_v8 = vsub.f32 %v198_v0, %v208_v7  ;;  %v210_v9 = vsub.f32 %v199_v1, %v208_v7 }
  0xd9   : > { %v207_v10 = vpop.xlane.xlu0 %206 }
  0xda   : > { %v211_v11 = vmul.f32 0.00390625, %v207_v10  ;;  %v219_v12 = vmul.f32 %v209_v8, %v209_v8  ;;  %v220_v13 = vmul.f32 %v210_v9, %v210_v9  ;;  %v241_v35 = vsel %vm240_vm2, %v207_v10, 0.0 }
  0xdc   : > { %v212_v14 = vsub.f32 %v200_v2, %v211_v11  ;;  %v213_v15 = vsub.f32 %v201_v4, %v211_v11  ;;  %v221_v16 = vadd.f32 %v220_v13, %v219_v12 }
  0xde   : > { %222 = vadd.xlane.f32.xlu1 %v221_v16  ;;  %v224_v17 = vmul.f32 %v212_v14, %v212_v14  ;;  %v225_v18 = vmul.f32 %v213_v15, %v213_v15  ;;  %v214_v19 = vmul.f32 %v212_v14, %v209_v8  ;;  %v215_v20 = vmul.f32 %v213_v15, %v210_v9 }
  0xe0   : > { %v226_v21 = vadd.f32 %v225_v18, %v224_v17  ;;  %v216_v22 = vadd.f32 %v215_v20, %v214_v19 }
  0xe2   : > { %227 = vadd.xlane.f32.xlu1 %v226_v21  ;;  %217 = vadd.xlane.f32.xlu0 %v216_v22 }
 0x167   : > { %v223_v23 = vpop.xlane.xlu1 %222 }
 0x168   : > { %v244_v37 = vsel %vm243_vm3, %v223_v23, 0.0 }
 0x16b   : > { %v228_v24 = vpop.xlane.xlu1 %227  ;;  %v218_v30 = vpop.xlane.xlu0 %217 }
 0x16c   : > { %v229_v25 = vmul.f32 %v228_v24, %v223_v23  ;;  %v247_v39 = vsel %vm246_vm4, %v228_v24, 0.0 }
 0x16e   : > { %v230_v26 = vmax.f32 %v229_v25, 1e-16 }
 0x170   : > { %400 = vrsqrt.f32 %v230_v26 }
 0x17d   : > { %v401_v29 = vpop.eup %400 }
 0x17e   : > { %v232_v31 = vmul.f32 %v401_v29, %v218_v30 }
 0x180   : > { %v236_v33 = vsel %vm235_vm1, %v232_v31, 0.0 }
 0x181   : > { %v239_v34 = vadd.f32 %v238_v32, %v236_v33 }
 0x183   : > { %v242_v36 = vadd.f32 %v241_v35, %v239_v34 }
 0x185   : > { %v245_v38 = vadd.f32 %v244_v37, %v242_v36 }
 0x187   : > { %v248_v40 = vadd.f32 %v247_v39, %v245_v38 }
 0x189   : > { %250 = vst.msk [vmem:[%s197_s25] sm:$0xff] %vm249_vm5, %v248_v40 }
 0x18a PF: > { %p15_p8 = scmp.ge.s32.totalorder %s537_s14, 6   ;;  %s678_s9 = smov %s488_s10 }
 0x18b   : > { %s679_s10 = smov %s492_s11  ;;  %s680_s11 = smov %s547_s17 }
 0x18c   : > { %s681_s12 = smov %s537_s14  ;;  %17 = sbr.rel (!%p15_p8) target bundleno = 5 (0x5), region = 81 }
 0x191   :  { %270 = vsyncpa [#allocation3], 1 }
 0x192   :  { %272 = vsyncpa [#allocation3 + $0x1], 1 }
 0x193   :  { %273 = vsyncpa [#allocation5], 1 }
 0x194   :  { %275 = vsyncpa [#allocation5 + $0x1], 1 }

</bundles_post_ra>
